<compile_context>
chip_gen: v7x
topology: tpu7x:2x2x1
jax: 0.10.0
libtpu: 0.0.40
codegen_flags: <defaults>
</compile_context>

<pallas_src>
import inspect

import numpy as np
import jax
import jax.numpy as jnp
from jax.experimental import pallas as pl
from jax.experimental.pallas import tpu as pltpu


_HAS_PIPELINE_MODE = (
    hasattr(pl, "Buffered")
    and "pipeline_mode" in inspect.signature(pl.BlockSpec).parameters
)


def _round_up(x, m):
    return -(-x // m) * m


def _bspec(shape, index_map, buffers=None):
    """BlockSpec helper; `buffers=1` marks a resident (constant index_map) input."""
    if buffers is not None and _HAS_PIPELINE_MODE:
        return pl.BlockSpec(shape, index_map, pipeline_mode=pl.Buffered(buffers))
    return pl.BlockSpec(shape, index_map)


# ----------------------------------------------------------------------------
# Pallas kernel: mean-pool over subword axis (L leading), then Linear + Tanh
# ----------------------------------------------------------------------------
def _pool_linear_tanh_kernel(x_ref, inv_ref, wt_ref, b_ref, o_ref):
    # x_ref: (L, TN, H).  Correctness NOTE: masked-out subword slots of the
    # packed tensor are exactly zero (it is built by scatter-into-zeros), so a
    # plain sum over L equals the masked sum.  Do not reuse a non-zeroed
    # buffer for `packed`.
    s = jnp.sum(x_ref[...].astype(jnp.float32), axis=0)           # (TN, H) f32
    mean = s * inv_ref[...]                                        # (TN, 1) bcast
    # Linear (y = mean @ W^T + b; we pass W^T) + Tanh.  Cast the LHS to the
    # weight dtype (bf16 or f32) for the MXU, accumulate in f32; bias/tanh in
    # f32 (v5e VPU/EUP have no bf16).
    y = jnp.tanh(
        jnp.dot(mean.astype(wt_ref.dtype), wt_ref[...],
                preferred_element_type=jnp.float32)
        + b_ref[...].astype(jnp.float32)
    )
    o_ref[...] = y.astype(o_ref.dtype)


def pooled_linear_tanh(packed_lnh, inv_cnt, w_t, b, tn, out_dtype):
    """packed_lnh: (L, Np, H) zero-padded subword embeddings (word axis padded
    to a multiple of tn); inv_cnt: (Np, 1) f32 reciprocal subword counts;
    w_t: (H, H) transposed weight; b: (H,) bias.  Returns (Np, H) in out_dtype."""
    L, Np, H = packed_lnh.shape
    assert Np % tn == 0
    xb = jnp.dtype(packed_lnh.dtype).itemsize
    wb = jnp.dtype(w_t.dtype).itemsize
    ob = jnp.dtype(out_dtype).itemsize

    # Explicit scoped-VMEM budget: 2x double-buffered x tile + resident W^T +
    # resident bias + inv tile + 2x output tile, with ~50% headroom.  Default
    # scoped limits (16 MiB v5e / 32 MiB v6e,v7x) are too small at prod shapes.
    need = (2 * L * tn * H * xb
            + H * H * wb
            + H * 4
            + 2 * tn * 4
            + 2 * tn * H * ob)
    vmem_limit = int(min(max(int(need * 1.5) + (2 << 20), 16 << 20), 128 << 20))

    return pl.pallas_call(
        _pool_linear_tanh_kernel,
        out_shape=jax.ShapeDtypeStruct((Np, H), out_dtype),
        grid=(Np // tn,),
        in_specs=[
            _bspec((L, tn, H), lambda i: (0, i, 0)),        # x stream (double-buffered)
            _bspec((tn, 1), lambda i: (i, 0)),              # 1 / subword count
            _bspec((H, H), lambda i: (0, 0), buffers=1),    # W^T, resident (1 buffer)
            _bspec((1, H), lambda i: (0, 0), buffers=1),    # bias, resident (1 buffer)
        ],
        out_specs=pl.BlockSpec((tn, H), lambda i: (i, 0)),
        compiler_params=pltpu.CompilerParams(
            dimension_semantics=("parallel",),
            vmem_limit_bytes=vmem_limit,
        ),
    )(packed_lnh, inv_cnt, w_t, b.reshape(1, H))


# ----------------------------------------------------------------------------
# Full SubwordAggregation.forward
# ----------------------------------------------------------------------------
def subword_aggregation_forward(inputs, batch, w_t, b, tn=None,
                                compute_dtype=jnp.bfloat16):
    """inputs: (B, plm_seq, H).  Returns (new_questions, new_tables, new_columns),
    each in inputs.dtype.  compute_dtype is the dtype of the HBM-resident
    packed tensor / weights fed to the kernel (bf16 halves the hot stream)."""
    H = inputs.shape[-1]
    flat_in = inputs.reshape(-1, H)
    out_dtype = inputs.dtype
    compute_dtype = jnp.dtype(compute_dtype)

    if tn is None:
        # 256 matches the 256x256 MXU on v6e/v7x with bf16; 128 for f32 / v5e.
        tn = 256 if compute_dtype == jnp.dtype(jnp.bfloat16) else 128

    segs = [
        ("question", batch["question_mask"]),
        ("table", batch["table_word_mask"]),
        ("column", batch["column_word_mask"]),
    ]
    sub_masks = [np.asarray(batch[p + "_subword_mask"]) for p, _ in segs]
    plm_masks = [np.asarray(batch[p + "_mask_plm"]) for p, _ in segs]

    L_max = max(m.shape[1] for m in sub_masks)
    n_words = [m.shape[0] for m in sub_masks]
    offsets = np.concatenate([[0], np.cumsum(n_words)]).astype(np.int64)
    N_total = int(offsets[-1])

    # Word-tile size: multiple of 16 (bf16 min sublane tile), never bigger than
    # the padded word count.  If one tile would hold everything but there is
    # enough work, split in two so v7x's two TensorCores both get a grid step.
    SUB = 16
    n_pad = _round_up(max(N_total, SUB), SUB)
    tn_eff = max(SUB, (min(int(tn), n_pad) // SUB) * SUB)
    if n_pad <= tn_eff:
        half = (n_pad // 2 // SUB) * SUB
        if half >= 64:
            tn_eff = half
    Np = _round_up(N_total, tn_eff)

    # Combined gather/scatter indices for all three segments -> one fused
    # (L_max, Np, H) packed tensor (L leading so the in-kernel reduction is a
    # plain VPU add and the word axis densely fills the sublanes).
    src_all, dst_all = [], []
    for i in range(3):
        sm = sub_masks[i]
        _, L = sm.shape
        src = np.flatnonzero(plm_masks[i].reshape(-1))
        idx = np.flatnonzero(sm.reshape(-1))
        assert src.size == idx.size, "subword mask / plm mask disagree"
        n_i, l_i = idx // L, idx % L
        dst = l_i * Np + (offsets[i] + n_i)          # row index into (L_max*Np, H)
        src_all.append(src)
        dst_all.append(dst)
    src_all = np.concatenate(src_all)
    dst_all = np.concatenate(dst_all)

    # Scatter into zeros in the (bf16) compute dtype.  The all-zero fill is
    # what makes the in-kernel plain sum a correct masked sum.
    packed = (
        jnp.zeros((L_max * Np, H), compute_dtype)
        .at[jnp.asarray(dst_all)]
        .set(flat_in[jnp.asarray(src_all)].astype(compute_dtype))
        .reshape(L_max, Np, H)
    )

    # Precomputed reciprocal subword counts (clamped to 1 for pad rows so no
    # NaNs; pad rows are never scattered back).
    cnt = np.zeros((Np,), np.float32)
    for i in range(3):
        cnt[offsets[i]:offsets[i + 1]] = sub_masks[i].sum(axis=1)
    inv_cnt = jnp.asarray((1.0 / np.maximum(cnt, 1.0)).reshape(Np, 1))

    # Hot path: fused mean-pool + Linear + Tanh for all three segments.
    pooled = pooled_linear_tanh(
        packed, inv_cnt, jnp.asarray(w_t).astype(compute_dtype),
        jnp.asarray(b).astype(jnp.float32), tn_eff, out_dtype)       # (Np, H)

    # masked_scatter_ back into the word-level tensors (Bw, Lw, H).
    outputs = []
    for i, (_, word_mask) in enumerate(segs):
        wm = np.asarray(word_mask)
        Bw, Lw = wm.shape
        out_idx = np.flatnonzero(wm.reshape(-1))
        rows = jnp.asarray(offsets[i] + np.arange(out_idx.size))
        out = (
            jnp.zeros((Bw * Lw, H), out_dtype)
            .at[jnp.asarray(out_idx)]
            .set(pooled[rows])
            .reshape(Bw, Lw, H)
        )
        outputs.append(out)
    return tuple(outputs)


# ----------------------------------------------------------------------------
# Pure-JAX reference (for verification)
# ----------------------------------------------------------------------------
def _reference(inputs, batch, w_t, b):
    H = inputs.shape[-1]
    flat_in = inputs.reshape(-1, H)
    outs = []
    for prefix, word_mask in (
        ("question", batch["question_mask"]),
        ("table", batch["table_word_mask"]),
        ("column", batch["column_word_mask"]),
    ):
        plm_mask = np.asarray(batch[prefix + "_mask_plm"])
        sub_mask = np.asarray(batch[prefix + "_subword_mask"])
        src_idx = np.flatnonzero(plm_mask.reshape(-1))
        dst_idx = np.flatnonzero(sub_mask.reshape(-1))
        Nw, L = sub_mask.shape
        packed = (
            jnp.zeros((Nw * L, H), inputs.dtype)
            .at[dst_idx]
            .set(flat_in[src_idx])
            .reshape(Nw, L, H)
        )
        mf = jnp.asarray(sub_mask, jnp.float32)[:, :, None]
        mean = (packed * mf).sum(axis=1) / mf.sum(axis=1)
        pooled = jnp.tanh(mean @ w_t + b)
        wm = np.asarray(word_mask)
        Bw, Lw = wm.shape
        out_idx = np.flatnonzero(wm.reshape(-1))
        outs.append(
            jnp.zeros((Bw * Lw, H), inputs.dtype)
            .at[out_idx]
            .set(pooled)
            .reshape(Bw, Lw, H)
        )
    return tuple(outs)


if __name__ == "__main__":
    B, PLM_SEQ, H = 2, 24, 32
    key = jax.random.PRNGKey(0)
    k_in, k_w, k_b = jax.random.split(key, 3)

    # Deterministic parameters for nn.Linear(H, H) (PoolingFunction mean-pooling)
    bound = 1.0 / np.sqrt(H)
    W = jax.random.uniform(k_w, (H, H), jnp.float32, -bound, bound)  # (out, in)
    bias = jax.random.uniform(k_b, (H,), jnp.float32, -bound, bound)
    W_t = W.T  # kernel computes mean @ W^T + b

    # PLM hidden states
    inputs = jax.random.normal(k_in, (B, PLM_SEQ, H), jnp.float32)

    # --------------- synthetic but self-consistent "batch" ------------------
    def _plm_mask(spans):
        m = np.zeros((B, PLM_SEQ), dtype=bool)
        for r, (s, e) in enumerate(spans):
            m[r, s:e] = True
        return m

    def _subword_mask(lens, max_len):
        m = np.zeros((len(lens), max_len), dtype=bool)
        for i, l in enumerate(lens):
            m[i, :l] = True
        return m

    def _word_mask(counts, max_len):
        m = np.zeros((len(counts), max_len), dtype=bool)
        for i, c in enumerate(counts):
            m[i, :c] = True
        return m

    batch = {
        # questions: item0 -> word subword lens [2,1,2]; item1 -> [1,3]
        "question_mask_plm": _plm_mask([(1, 6), (1, 5)]),
        "question_subword_mask": _subword_mask([2, 1, 2, 1, 3], 3),
        "question_mask": _word_mask([3, 2], 3),
        # tables: item0 -> [1,2]; item1 -> [2]
        "table_mask_plm": _plm_mask([(7, 10), (6, 8)]),
        "table_subword_mask": _subword_mask([1, 2, 2], 2),
        "table_word_mask": _word_mask([2, 1], 2),
        # columns: item0 -> [2,1]; item1 -> [1,1,2]
        "column_mask_plm": _plm_mask([(11, 14), (9, 13)]),
        "column_subword_mask": _subword_mask([2, 1, 1, 1, 2], 2),
        "column_word_mask": _word_mask([2, 3], 3),
    }

    ref_q, ref_t, ref_c = _reference(inputs, batch, W_t, bias)

    # Exact check: f32 compute path against the pure-JAX reference.
    q32, t32, c32 = subword_aggregation_forward(
        inputs, batch, W_t, bias, compute_dtype=jnp.float32)
    jax.block_until_ready((q32, t32, c32))
    np.testing.assert_allclose(np.asarray(q32), np.asarray(ref_q), rtol=1e-5, atol=1e-5)
    np.testing.assert_allclose(np.asarray(t32), np.asarray(ref_t), rtol=1e-5, atol=1e-5)
    np.testing.assert_allclose(np.asarray(c32), np.asarray(ref_c), rtol=1e-5, atol=1e-5)

    # Default fast path: bf16 packed x / W^T on the HBM stream, f32 accumulate
    # in-kernel, f32 (inputs.dtype) output.  Loose tolerance for bf16 rounding.
    qbf, tbf, cbf = subword_aggregation_forward(inputs, batch, W_t, bias)
    jax.block_until_ready((qbf, tbf, cbf))
    np.testing.assert_allclose(np.asarray(qbf), np.asarray(ref_q), rtol=5e-2, atol=5e-2)
    np.testing.assert_allclose(np.asarray(tbf), np.asarray(ref_t), rtol=5e-2, atol=5e-2)
    np.testing.assert_allclose(np.asarray(cbf), np.asarray(ref_c), rtol=5e-2, atol=5e-2)

    print("KERNEL_OK")
</pallas_src>

<mosaic_0001>
module attributes {stable_mosaic.version = 11 : i64} {
  func.func @_pool_linear_tanh_kernel(%arg0: i32, %arg1: memref<3x16x32xf32, #tpu.memory_space<vmem>>, %arg2: memref<16x1xf32, #tpu.memory_space<vmem>>, %arg3: memref<32x32xf32, #tpu.memory_space<vmem>>, %arg4: memref<1x32xf32, #tpu.memory_space<vmem>>, %arg5: memref<16x32xf32, #tpu.memory_space<vmem>>) attributes {dimension_semantics = [#tpu.dimension_semantics<parallel>], iteration_bounds = array<i64: 1>, scalar_prefetch = 0 : i64, scratch_operands = 0 : i64, tpu.core_type = #tpu.core_type<tc>, window_params = [{transform_indices = @transform_0, window_bounds = array<i64: 3, 16, 32>}, {transform_indices = @transform_1, window_bounds = array<i64: 16, 1>}, {pipeline_mode = #tpu.pipeline_mode<synchronous>, transform_indices = @transform_2, window_bounds = array<i64: 32, 32>}, {pipeline_mode = #tpu.pipeline_mode<synchronous>, transform_indices = @transform_3, window_bounds = array<i64: 1, 32>}, {transform_indices = @transform_4, window_bounds = array<i64: 16, 32>}]} {
    %c0 = arith.constant 0 : index
    %c0_0 = arith.constant 0 : index
    %c0_1 = arith.constant 0 : index
    %0 = vector.load %arg1[%c0, %c0_0, %c0_1] : memref<3x16x32xf32, #tpu.memory_space<vmem>>, vector<3x16x32xf32>
    %cst = arith.constant dense<0.000000e+00> : vector<16x32xf32>
    %1 = vector.multi_reduction <add>, %0, %cst [0] : vector<3x16x32xf32> to vector<16x32xf32>
    %c0_2 = arith.constant 0 : index
    %c0_3 = arith.constant 0 : index
    %2 = vector.load %arg2[%c0_2, %c0_3] : memref<16x1xf32, #tpu.memory_space<vmem>>, vector<16x1xf32>
    %3 = vector.broadcast %2 : vector<16x1xf32> to vector<16x32xf32>
    %4 = arith.mulf %1, %3 : vector<16x32xf32>
    %c0_4 = arith.constant 0 : index
    %c0_5 = arith.constant 0 : index
    %5 = vector.load %arg3[%c0_4, %c0_5] : memref<32x32xf32, #tpu.memory_space<vmem>>, vector<32x32xf32>
    %cst_6 = arith.constant dense<0.000000e+00> : vector<16x32xf32>
    %6 = tpu.matmul %4, %5, %cst_6 {dimension_numbers = #tpu.dot_dimension_numbers<[1], [0], [0], [1], [0, 0, 1, 1], [], []>} : vector<16x32xf32>, vector<32x32xf32>, vector<16x32xf32> -> vector<16x32xf32>
    %c0_7 = arith.constant 0 : index
    %c0_8 = arith.constant 0 : index
    %7 = vector.load %arg4[%c0_7, %c0_8] : memref<1x32xf32, #tpu.memory_space<vmem>>, vector<1x32xf32>
    %8 = vector.broadcast %7 : vector<1x32xf32> to vector<16x32xf32>
    %9 = arith.addf %6, %8 : vector<16x32xf32>
    %10 = math.tanh %9 : vector<16x32xf32>
    %c0_9 = arith.constant 0 : index
    %c0_10 = arith.constant 0 : index
    %11 = vector.load %arg5[%c0_9, %c0_10] : memref<16x32xf32, #tpu.memory_space<vmem>>, vector<16x32xf32>
    tpu.vector_store %arg5[%c0_9, %c0_10], %10 {strides = array<i32>} : memref<16x32xf32, #tpu.memory_space<vmem>>, vector<16x32xf32>,
    return
  }
  func.func @transform_0(%arg0: i32) -> (i32, i32, i32) {
    %c0_i32 = arith.constant 0 : i32
    %c0_i32_0 = arith.constant 0 : i32
    %c0_i32_1 = arith.constant 0 : i32
    return %c0_i32, %arg0, %c0_i32_0 : i32, i32, i32
  }
  func.func @transform_1(%arg0: i32) -> (i32, i32) {
    %c0_i32 = arith.constant 0 : i32
    %c0_i32_0 = arith.constant 0 : i32
    return %arg0, %c0_i32 : i32, i32
  }
  func.func @transform_2(%arg0: i32) -> (i32, i32) {
    %c0_i32 = arith.constant 0 : i32
    %c0_i32_0 = arith.constant 0 : i32
    %c0_i32_1 = arith.constant 0 : i32
    return %c0_i32, %c0_i32_0 : i32, i32
  }
  func.func @transform_3(%arg0: i32) -> (i32, i32) {
    %c0_i32 = arith.constant 0 : i32
    %c0_i32_0 = arith.constant 0 : i32
    %c0_i32_1 = arith.constant 0 : i32
    return %c0_i32, %c0_i32_0 : i32, i32
  }
  func.func @transform_4(%arg0: i32) -> (i32, i32) {
    %c0_i32 = arith.constant 0 : i32
    %c0_i32_0 = arith.constant 0 : i32
    return %arg0, %c0_i32 : i32, i32
  }
}

</mosaic_0001>

<bundles_post_ra>
// kernel: tpu_custom_call.1
= control target key start
LH: loop header
LB: loop body
LE: loop exit
PB: predicated region body
PF: predicated region fallthrough
CT: control target
= control target key end

     0   :  { %9 = vsyncpa [#allocation3], 0  ;;  %s397_s0 = inlined_call_operand.hbm [shape: f32[3,16,32], index: 0, kind: input, shape index: {}]   ;;  %s398_s1 = inlined_call_operand.vmem [shape: f32[16,1], index: 1, kind: input, shape index: {}]   ;;  %s399_s2 = inlined_call_operand.hbm [shape: f32[32,32], index: 2, kind: input, shape index: {}]   ;;  %s400_s3 = inlined_call_operand.vmem [shape: f32[1,32], index: 3, kind: input, shape index: {}]   ;;  %s401_s4 = inlined_call_operand.hbm [shape: f32[16,32], index: 4, kind: output, shape index: {}]  }
   0x1   :  { %10 = vsyncpa [#allocation6], 0 }
   0x2   :  { %11 = vsyncpa [#allocation4], 0  ;;  %s302_s15 = smov [#allocation2]   ;;  %s230_s19 = scalar_lea.hbm %s397_s0, 768 }
   0x3   :  { %s17_s16 = sshll.u32 %s302_s15, 4  ;;  %p231_p0 = scmp.ne.s32.totalorder %s397_s0, %s230_s19  ;;  %s18_s16 = int_to_ptr.vmem [resolvable:$true] %s17_s16 }
   0x4   :  { %p234_p1 = scmp.lt.u32.totalorder %s230_s19, %s397_s0 }
   0x6   :  { %p236_p2 = pnand %p234_p1, %p231_p0 }
   0x8   :  { %239 = shalt.err (!%p236_p2)
}
   0x9   :  { %s240_s24 = scalar_lea.vmem %s18_s16, 768  ;;  %p245_p4 = scmp.lt.s32.totalorder %s18_s16, %s18_s16 }
   0xa   :  { %p241_p3 = scmp.ne.s32.totalorder %s18_s16, %s240_s24  ;;  %p246_p5 = scmp.lt.s32.totalorder %s240_s24, %s240_s24 }
   0xc   :  { %p247_p6 = por %p246_p5, %p245_p4 }
   0xe   :  { %p248_p7 = pnand %p247_p6, %p241_p3 }
  0x10   :  { %251 = shalt.err (!%p248_p7)
}
  0x11   :  { %s303_s25 = smov 128   ;;  %s304_s26 = smov 8  }
  0x12   :  { %23 = dma.hbm_to_vmem [thread:$0]  %s397_s0, 768, %s18_s16, [#allocation3], %s303_s25, %s303_s25, %s304_s26  }
  0x13   :  { %s305_s29 = smov [#allocation5]   ;;  %s252_s7 = scalar_lea.hbm %s399_s2, 512 }
  0x14   :  { %s31_s30 = sshll.u32 %s305_s29, 4  ;;  %p253_p8 = scmp.ne.s32.totalorder %s399_s2, %s252_s7  ;;  %s32_s30 = int_to_ptr.vmem [resolvable:$true] %s31_s30 }
  0x15   :  { %p256_p9 = scmp.lt.u32.totalorder %s252_s7, %s399_s2 }
  0x17   :  { %p258_p10 = pnand %p256_p9, %p253_p8 }
  0x19   :  { %261 = shalt.err (!%p258_p10)
}
  0x1a   :  { %s262_s12 = scalar_lea.vmem %s32_s30, 512  ;;  %p267_p12 = scmp.lt.s32.totalorder %s32_s30, %s32_s30 }
  0x1b   :  { %p263_p11 = scmp.ne.s32.totalorder %s32_s30, %s262_s12  ;;  %p268_p13 = scmp.lt.s32.totalorder %s262_s12, %s262_s12 }
  0x1d   :  { %p269_p0 = por %p268_p13, %p267_p12 }
  0x1f   :  { %p270_p1 = pnand %p269_p0, %p263_p11 }
  0x21   :  { %273 = shalt.err (!%p270_p1)
}
  0x22   :  { %37 = dma.hbm_to_vmem [thread:$0]  %s399_s2, 512, %s32_s30, [#allocation6], %s303_s25, %s303_s25, %s304_s26  }
  0x23   :  { %296 = dma.done.wait [#allocation3], 768  }
  0x24   :  { %297 = vsyncadd [#allocation3], 4294966528 }
  0x25   :  { %298 = dma.done.wait [#allocation6], 512  }
  0x26   :  { %299 = vsyncadd [#allocation6], 4294966784  ;;  %v306_v0 = vmov 0   ;;  %v63_v1 = vld [vmem:[%s398_s1] sm:$0xff]  ;;  %v77_v2 = vld [vmem:[#allocation5] sm:$0xff]  ;;  %vm52_vm0 = vcmask 261120  }
  0x27   :  { %225 = vset.pattern.permute.xlu0 %v306_v0  ;;  %v78_v3 = vld [vmem:[#allocation5 + $0x8] sm:$0xff]  ;;  %v64_v4 = vld [vmem:[%s398_s1 + $0x8] sm:$0xff]  ;;  %v79_v6 = vld [vmem:[#allocation5 + $0x10] sm:$0xff]  ;;  %s307_s18 = smov [#allocation7]  }
  0x28   :  { %67 = vperm.xlu0 %225, %v63_v1   ;;  %v211_v5 = vpack.c.bf16 %v78_v3, %v77_v2  ;;  %v80_v7 = vld [vmem:[#allocation5 + $0x18] sm:$0xff]  ;;  %v46_v9 = vld [vmem:[#allocation2] sm:$0xff]  ;;  %v48_v10 = vld [vmem:[#allocation2 + $0x10] sm:$0xff]  ;;  %s178_s19 = sshll.u32 %s307_s18, 4  ;;  %s179_s19 = int_to_ptr.vmem [resolvable:$true] %s178_s19 }
  0x29   :  { %v215_v8 = vpack.c.bf16 %v80_v7, %v79_v6  ;;  %v53_v11 = vsel %vm52_vm0, %v46_v9, 0.0  ;;  %v54_v12 = vsel %vm52_vm0, %v48_v10, 0.0  ;;  %v50_v13 = vld [vmem:[#allocation2 + $0x20] sm:$0xff]  ;;  %v47_v14 = vld [vmem:[#allocation2 + $0x8] sm:$0xff]  ;;  %v49_v15 = vld [vmem:[#allocation2 + $0x18] sm:$0xff]  ;;  %s274_s20 = scalar_lea.vmem %s179_s19, 256  ;;  %p279_p3 = scmp.lt.s32.totalorder %s179_s19, %s179_s19 }
  0x2a   :  { %212 = vmatprep.subr.bf16.mxu0 %v211_v5  ;;  %v55_v16 = vadd.f32 %v54_v12, %v53_v11  ;;  %v56_v17 = vsel %vm52_vm0, %v50_v13, 0.0  ;;  %v58_v18 = vsel %vm52_vm0, %v47_v14, 0.0  ;;  %v59_v19 = vsel %vm52_vm0, %v49_v15, 0.0  ;;  %v51_v20 = vld [vmem:[#allocation2 + $0x28] sm:$0xff]  ;;  %v191_v29 = vld [vmem:[%s400_s3] ss:$0 sm:$0xff]  ;;  %p275_p2 = scmp.ne.s32.totalorder %s179_s19, %s274_s20  ;;  %p280_p4 = scmp.lt.s32.totalorder %s274_s20, %s274_s20 }
  0x2b   :  { %214 = vmatpush3.bf16.msra.mxu0 %v211_v5  ;;  %v60_v22 = vadd.f32 %v59_v19, %v58_v18  ;;  %v61_v23 = vsel %vm52_vm0, %v51_v20, 0.0 }
  0x2c   :  { %72 = vperm.xlu0 %225, %v64_v4   ;;  %216 = vmatprep.subr.bf16.mxu0 %v215_v8  ;;  %v57_v21 = vadd.f32 %v56_v17, %v55_v16  ;;  %p281_p5 = por %p280_p4, %p279_p3 }
  0x2d   :  { %v62_v26 = vadd.f32 %v61_v23, %v60_v22 }
  0x2e   :  { %p282_p6 = pnand %p281_p5, %p275_p2 }
  0x2f   :  { %218 = vmatpush3.bf16.msra.mxu0 %v215_v8 }
  0xa7   :  { %v68_v24 = vpop.permute.xlu0 %67 }
  0xa8   :  { %v75_v25 = vmul.f32 %v68_v24, %v57_v21 }
  0xaa   :  { %208 = vmatprep.mubr.msk.f32.mxu0 %vm52_vm0, %v75_v25 }
  0xab   :  { %v73_v27 = vpop.permute.xlu0 %72 }
  0xac   :  { %v76_v28 = vmul.f32 %v73_v27, %v62_v26 }
  0xae   :  { %209 = vmatmul.mubr.msk.f32.vlgmr.msra.gmra.mrb[0].mxu0 %vm52_vm0, %v76_v28 }
 0x181   :  { %v210_v30 = vpop.f32.mrb[0].mxu0 }
 0x182   :  { %v166_v31 = vadd.f32 %v210_v30, %v191_v29  ;;  %v160_v32 = vpop.f32.mrb[1].mxu0 }
 0x183   :  { %v161_v33 = vadd.f32 %v191_v29, %v160_v32 }
 0x184   :  { %226 = vtanh.f32 %v166_v31 }
 0x185   :  { %228 = vtanh.f32 %v161_v33 }
 0x18e   :  { %v227_v34 = vpop.eup %226 }
 0x18f   :  { %v229_v35 = vpop.eup %228  ;;  %172 = vst.msk [vmem:[#allocation7 + $0x8] sm:$0xff] %vm52_vm0, %v227_v34 }
 0x190   :  { %171 = vst.msk [vmem:[#allocation7] sm:$0xff] %vm52_vm0, %v229_v35 }
 0x191   :  { %285 = shalt.err (!%p282_p6)
}
 0x192   :  { %s286_s22 = scalar_lea.hbm %s401_s4, 256 }
 0x193   :  { %p287_p7 = scmp.ne.s32.totalorder %s401_s4, %s286_s22  ;;  %p290_p8 = scmp.lt.u32.totalorder %s286_s22, %s401_s4 }
 0x195   :  { %p292_p9 = pnand %p290_p8, %p287_p7 }
 0x197   :  { %295 = shalt.err (!%p292_p9)
}
 0x198   :  { %184 = dma.vmem_to_hbm [thread:$0]  %s179_s19, 256, %s401_s4, [#allocation4], %s303_s25, %s303_s25, %s304_s26  }
 0x199   :  { %300 = dma.done.wait [#allocation4], 256  }
 0x19a   :  { %301 = vsyncadd [#allocation4], 4294967040 }
 0x19b   :  { %188 = vsyncpa [#allocation3], 1 }
 0x19c   :  { %189 = vsyncpa [#allocation6], 1 }
 0x19d   :  { %190 = vsyncpa [#allocation4], 1 }

</bundles_post_ra>
